<compile_context>
chip_gen: v7x
topology: tpu7x:2x2x1
jax: 0.10.0
libtpu: 0.0.40
codegen_flags: <defaults>
</compile_context>

<pallas_src>
import jax
import jax.numpy as jnp
from jax.experimental import pallas as pl
from jax.experimental.pallas import tpu as pltpu


# ----------------------------- host-side helpers ----------------------------

def _centered_dft_matrix(n):
    """D[k, m] = exp(-2j*pi*(k - n//2)*(m - n//2)/n) == fftshift . FFT . ifftshift.
    The (k*m) product is reduced mod n in int32 before the float conversion so
    the angle stays accurate for large n.  (k*m fits in int32 for n < ~46000,
    far beyond realistic grid sizes.)"""
    k = jnp.arange(n, dtype=jnp.int32) - (n // 2)
    km = (k[:, None] * k[None, :]) % n
    ang = (-2.0 * jnp.pi / n) * km.astype(jnp.float32)
    return jnp.cos(ang), jnp.sin(ang)


def _choose_fold(B, S, W, H):
    """Lane-stacking plan: fold Gc (d,wl) slabs and (if still < 128 lanes) Gb
    batch elements along the lane axis so the kernel's last dim reaches 128
    (lane-dense stores + filled MXU N-dim), then split H into NH row blocks so
    the grid keeps >= 2 independent parallel steps (v7x has 2 TensorCores)."""
    if W >= 128:
        Gc, Gb = 1, 1
    else:
        Gc = min(S, max(1, 128 // W))
        while S % Gc:
            Gc -= 1
        Gb = 1
        if Gc * W < 128:
            Gb = min(B, max(1, 128 // (Gc * W)))
            while B % Gb:
                Gb -= 1
    NB, NG = B // Gb, S // Gc
    NH = 2 if (NB * NG < 2 and H % 16 == 0) else 1
    return Gb, Gc, NB, NG, NH


def build_packed(H, W, wl, d, dx, dy, Gb, Gc):
    """Host-side precompute.

    Returns
      ah_pack: (NG, 2, H, LGW)   [cos, sin] of the source quadratic phase AH(v),
                                 pre-expanded over the lane stack.
      bh_pack: (NG, 2, H, LGW)   [cos, sin] of the post phase BH(v) with the
                                 constant 2*pi*d/wl - pi/2 folded in.
      dh_pack: (2, H, H)         centered row-DFT matrix [re, im].
      bd_pack: (NG, 2, LGW, LGW) complex block-diag RHS with exp(i*AW), D_W^T
                                 and m*exp(i*BW) all folded into the matmul.
    """
    wl = jnp.asarray(wl, jnp.float32)            # (Nw,)
    d = jnp.asarray(d, jnp.float32)              # (Nd,)
    Nd, Nw = d.shape[0], wl.shape[0]
    S = Nd * Nw
    NG = S // Gc
    LGW = Gb * Gc * W

    prod = (d[:, None] * wl[None, :]).reshape(-1)          # (S,)  wl*d, s = dd*Nw+ww
    du = prod / (dx * W)                                    # backward delta_mode
    dv = prod / (dy * H)
    a = jnp.pi / prod

    iu = jnp.arange(W, dtype=jnp.float32) - (W // 2)
    iv = jnp.arange(H, dtype=jnp.float32) - (H // 2)

    AH = a[:, None] * (dv[:, None] * iv[None, :]) ** 2      # (S, H)
    AW = a[:, None] * (du[:, None] * iu[None, :]) ** 2      # (S, W)
    # TODO(synk): source does `distance.unsqueeze(-4) / wl`, which errors for a
    # 1-D distance tensor; implemented the intended broadcast 2*pi*d/wl per (N_d, N_wl).
    const = (2.0 * jnp.pi * d[:, None] / wl[None, :] - jnp.pi / 2.0).reshape(-1)
    BH = a[:, None] * (dy * iv[None, :]) ** 2 + const[:, None]   # (S, H)
    BW = a[:, None] * (dx * iu[None, :]) ** 2                    # (S, W)
    m = du * dv / prod                                            # dft_scale * scale_factor

    # H-direction planes, pre-expanded to (NG, H, LGW) so the kernel does only
    # full-tile VPU multiplies (no per-slab broadcasts / masked stores).
    # Lane order inside LGW: (bb in Gb, j in Gc, w in W).
    def expand_h(x):                                  # (S, H) -> (NG, H, LGW)
        t = x.reshape(NG, Gc, H).transpose(0, 2, 1)   # (NG, H, Gc)
        t = jnp.broadcast_to(t[:, :, None, :, None], (NG, H, Gb, Gc, W))
        return t.reshape(NG, H, LGW)

    ah_pack = jnp.stack([expand_h(jnp.cos(AH)), expand_h(jnp.sin(AH))], axis=1)
    bh_pack = jnp.stack([expand_h(jnp.cos(BH)), expand_h(jnp.sin(BH))], axis=1)

    # Centered DFT matrices.
    dhr, dhi = _centered_dft_matrix(H)
    dh_pack = jnp.stack([dhr, dhi], axis=0)                       # (2, H, H)

    dwr, dwi = _centered_dft_matrix(W)
    DW = (dwr + 1j * dwi).astype(jnp.complex64)                   # symmetric
    # Per-slab RHS: R_s = diag(exp(i*AW_s)) @ D_W^T @ diag(m_s * exp(i*BW_s)).
    eAW = jnp.exp(1j * AW).astype(jnp.complex64)                  # (S, W)
    eBW = (m[:, None] * jnp.exp(1j * BW)).astype(jnp.complex64)   # (S, W)
    R = eAW[:, :, None] * DW.T[None, :, :] * eBW[:, None, :]      # (S, W, W)
    # Block-diagonal over the lane stack: kron(I_Gb, blkdiag_j(R_{g*Gc+j})).
    Rg = R.reshape(NG, Gc, W, W)
    eye_c = jnp.eye(Gc, dtype=jnp.complex64)
    bd = (Rg[:, :, :, None, :] * eye_c[None, :, None, :, None]
          ).reshape(NG, Gc * W, Gc * W)
    eye_b = jnp.eye(Gb, dtype=jnp.complex64)
    bd = (bd[:, None, :, None, :] * eye_b[None, :, None, :, None]
          ).reshape(NG, LGW, LGW)
    bd_pack = jnp.stack([jnp.real(bd), jnp.imag(bd)], axis=1).astype(jnp.float32)

    return ah_pack, bh_pack, dh_pack, bd_pack


# ------------------------------ Pallas wrapper -------------------------------

def fresnel_ft_forward(pupil_re, pupil_im, wl, d, dx, dy):
    B, H, W = pupil_re.shape
    Nd, Nw = len(d), len(wl)
    S = Nd * Nw

    Gb, Gc, NB, NG, NH = _choose_fold(B, S, W, H)
    LGW = Gb * Gc * W
    HB = H // NH

    ah_pack, bh_pack, dh_pack, bd_pack = build_packed(H, W, wl, d, dx, dy, Gb, Gc)

    # Pupil pre-tiled to the lane-stacked layout (B folded -> NB groups).
    def tile_pupil(p):                                    # (B, H, W) -> (NB, H, LGW)
        t = p.reshape(NB, Gb, H, W).transpose(0, 2, 1, 3)  # (NB, H, Gb, W)
        t = jnp.broadcast_to(t[:, :, :, None, :], (NB, H, Gb, Gc, W))
        return t.reshape(NB, H, LGW)

    pup_pack = jnp.stack([tile_pupil(pupil_re), tile_pupil(pupil_im)], axis=1)

    def kernel(pup_ref, ah_ref, bh_ref, dh_ref, bd_ref, or_ref, oi_ref):
        pr = pup_ref[0, 0]        # (H, LGW) pupil real, lane-stacked
        pim = pup_ref[0, 1]       # (H, LGW) pupil imag
        ahc = ah_ref[0, 0]        # (H, LGW) cos(AH)
        ahs = ah_ref[0, 1]        # (H, LGW) sin(AH)

        # Y = pupil * exp(i*AH): full-tile VPU multiplies; values stay in vregs
        # (no scratch round trip, no per-slab masked stores).
        yr = pr * ahc - pim * ahs
        yi = pr * ahs + pim * ahc

        # T = D_H[row block] @ Y : direct 4-matmul complex product (the MXU has
        # large slack at these shapes, so the Gauss trick is not worth its VPU adds).
        dhr = dh_ref[0]           # (HB, H)
        dhi = dh_ref[1]
        tr = (jnp.dot(dhr, yr, preferred_element_type=jnp.float32)
              - jnp.dot(dhi, yi, preferred_element_type=jnp.float32))
        ti = (jnp.dot(dhr, yi, preferred_element_type=jnp.float32)
              + jnp.dot(dhi, yr, preferred_element_type=jnp.float32))

        # F = T @ BD, where BD already folds exp(i*AW), D_W^T and m*exp(i*BW).
        bdr = bd_ref[0, 0]        # (LGW, LGW)
        bdi = bd_ref[0, 1]
        fr = (jnp.dot(tr, bdr, preferred_element_type=jnp.float32)
              - jnp.dot(ti, bdi, preferred_element_type=jnp.float32))
        fi = (jnp.dot(tr, bdi, preferred_element_type=jnp.float32)
              + jnp.dot(ti, bdr, preferred_element_type=jnp.float32))

        # out = F * exp(i*BH): full-tile VPU multiply, lane-dense stores.
        bhc = bh_ref[0, 0]        # (HB, LGW)
        bhs = bh_ref[0, 1]
        or_ref[0, 0] = fr * bhc - fi * bhs
        oi_ref[0, 0] = fr * bhs + fi * bhc

    pup_spec = pl.BlockSpec((1, 2, H, LGW), lambda b, g, h: (b, 0, 0, 0))
    ah_spec = pl.BlockSpec((1, 2, H, LGW), lambda b, g, h: (g, 0, 0, 0))
    bh_spec = pl.BlockSpec((1, 2, HB, LGW), lambda b, g, h: (g, 0, h, 0))
    dh_spec = pl.BlockSpec((2, HB, H), lambda b, g, h: (0, h, 0))
    bd_spec = pl.BlockSpec((1, 2, LGW, LGW), lambda b, g, h: (g, 0, 0, 0))
    o_spec = pl.BlockSpec((1, 1, HB, LGW), lambda b, g, h: (b, g, h, 0))

    # VMEM limit from the actual block footprint (double buffered) with slack,
    # capped at 48 MiB (safe on v7x's 64 MiB; raise toward ~96 MiB on v5e/v6e
    # for large production H).
    blk_bytes = 4 * (2 * H * LGW        # pupil re+im
                     + 2 * H * LGW      # AH cos/sin
                     + 2 * HB * LGW     # BH cos/sin
                     + 2 * HB * H       # D_H re/im
                     + 2 * LGW * LGW    # block-diag RHS re/im
                     + 2 * HB * LGW)    # output re/im
    vmem_limit = int(min(max(2 * blk_bytes + (4 << 20), 32 << 20), 48 << 20))

    out_re, out_im = pl.pallas_call(
        kernel,
        out_shape=(jax.ShapeDtypeStruct((NB, NG, H, LGW), jnp.float32),
                   jax.ShapeDtypeStruct((NB, NG, H, LGW), jnp.float32)),
        grid_spec=pltpu.PrefetchScalarGridSpec(
            num_scalar_prefetch=0,
            grid=(NB, NG, NH),
            in_specs=[pup_spec, ah_spec, bh_spec, dh_spec, bd_spec],
            out_specs=[o_spec, o_spec]),
        compiler_params=pltpu.CompilerParams(
            dimension_semantics=("parallel", "parallel", "parallel"),
            vmem_limit_bytes=vmem_limit),
    )(pup_pack, ah_pack, bh_pack, dh_pack, bd_pack)

    # Wrapper-side layout plumbing: (NB, NG, H, Gb*Gc*W) -> (B, Nd, Nw, H, W).
    if Gb == 1 and Gc == 1:
        # Output is already in (B, S, H, W) order: pure reshape, no transpose.
        def unstack(o):
            return o.reshape(B, Nd, Nw, H, W)
    else:
        def unstack(o):
            o = o.reshape(NB, NG, H, Gb, Gc, W).transpose(0, 3, 1, 4, 2, 5)
            return o.reshape(B, Nd, Nw, H, W)

    return unstack(out_re) + 1j * unstack(out_im)


# ------------------------------- pure-JAX reference -------------------------

def build_cache(H, W, wl, d, dx, dy):
    """Replicates _init_ft_common(far_field=False, delta_mode='backward',
    ampl_phase_form=False, phase_factor=True, scale_factor=True)."""
    wl = jnp.asarray(wl, jnp.float32)        # (N_wl,)
    d = jnp.asarray(d, jnp.float32)          # (N_d,)
    prod = wl[None, :] * d[:, None]          # (N_d, N_wl) = wl * d
    du = prod / (dx * W)
    dv = prod / (dy * H)
    phase_scale = jnp.pi / prod

    iu = jnp.arange(W, dtype=jnp.float32) - (W // 2)
    iv = jnp.arange(H, dtype=jnp.float32) - (H // 2)
    u = du[:, :, None, None] * iu[None, None, None, :]
    v = dv[:, :, None, None] * iv[None, None, :, None]
    qp = phase_scale[:, :, None, None] * (u ** 2 + v ** 2)
    q_re, q_im = jnp.cos(qp), jnp.sin(qp)

    x = dx * iu
    y = dy * iv
    post_phase = phase_scale[:, :, None, None] * (
        x[None, None, None, :] ** 2 + y[None, None, :, None] ** 2)
    post_phase = post_phase + (2.0 * jnp.pi * d[:, None] / wl[None, :]
                               - jnp.pi / 2.0)[:, :, None, None]
    pf_re, pf_im = jnp.cos(post_phase), jnp.sin(post_phase)
    scale = 1.0 / prod
    return q_re, q_im, du, dv, pf_re, pf_im, scale


def reference_forward(pupil, q_re, q_im, du, dv, pf_re, pf_im, scale):
    """Pure-JAX reference mirroring _ft_common step by step."""
    qpf = (q_re + 1j * q_im).astype(jnp.complex64)
    p = pupil[:, None, None, :, :] * qpf[None]
    f = jnp.fft.fftshift(
        jnp.fft.fft2(jnp.fft.ifftshift(p, axes=(-2, -1)), axes=(-2, -1)),
        axes=(-2, -1))
    f = f * (du * dv)[None, :, :, None, None]          # dft_scale
    f = f * (pf_re + 1j * pf_im)[None]                  # phase_factor
    f = f * scale[None, :, :, None, None]               # scale_factor
    return f


# --------------------------------- main --------------------------------------

if __name__ == "__main__":
    key = jax.random.PRNGKey(0)
    B, H, W = 2, 16, 16
    wl = [0.5, 0.6]          # N_wl = 2 wavelengths
    d = [10.0, 12.0]         # N_d = 2 propagation distances
    dx = dy = 0.25           # delta_mode='backward' target-plane spacing

    k1, k2 = jax.random.split(key)
    pupil_re = jax.random.normal(k1, (B, H, W), jnp.float32)
    pupil_im = jax.random.normal(k2, (B, H, W), jnp.float32)

    out = fresnel_ft_forward(pupil_re, pupil_im, wl, d, dx, dy)
    out = jax.block_until_ready(out)

    q_re, q_im, du, dv, pf_re, pf_im, scale = build_cache(H, W, wl, d, dx, dy)
    ref = reference_forward(pupil_re + 1j * pupil_im, q_re, q_im,
                            du, dv, pf_re, pf_im, scale)
    rel_err = float(jnp.max(jnp.abs(out - ref)) / jnp.max(jnp.abs(ref)))
    assert rel_err < 1e-3, f"relative error too large: {rel_err}"
    print("KERNEL_OK")
</pallas_src>

<mosaic_0001>
module attributes {stable_mosaic.version = 11 : i64} {
  func.func @kernel(%arg0: i32, %arg1: i32, %arg2: i32, %arg3: memref<1x2x16x128xf32, #tpu.memory_space<vmem>>, %arg4: memref<1x2x16x128xf32, #tpu.memory_space<vmem>>, %arg5: memref<1x2x8x128xf32, #tpu.memory_space<vmem>>, %arg6: memref<2x8x16xf32, #tpu.memory_space<vmem>>, %arg7: memref<1x2x128x128xf32, #tpu.memory_space<vmem>>, %arg8: memref<1x1x8x128xf32, #tpu.memory_space<vmem>>, %arg9: memref<1x1x8x128xf32, #tpu.memory_space<vmem>>) attributes {dimension_semantics = [#tpu.dimension_semantics<parallel>, #tpu.dimension_semantics<parallel>, #tpu.dimension_semantics<parallel>], iteration_bounds = array<i64: 1, 1, 2>, scalar_prefetch = 0 : i64, scratch_operands = 0 : i64, tpu.core_type = #tpu.core_type<tc>, window_params = [{transform_indices = @transform_0, window_bounds = array<i64: 1, 2, 16, 128>}, {transform_indices = @transform_1, window_bounds = array<i64: 1, 2, 16, 128>}, {transform_indices = @transform_2, window_bounds = array<i64: 1, 2, 8, 128>}, {transform_indices = @transform_3, window_bounds = array<i64: 2, 8, 16>}, {transform_indices = @transform_4, window_bounds = array<i64: 1, 2, 128, 128>}, {transform_indices = @transform_5, window_bounds = array<i64: 1, 1, 8, 128>}, {transform_indices = @transform_6, window_bounds = array<i64: 1, 1, 8, 128>}]} {
    %c0 = arith.constant 0 : index
    %c0_0 = arith.constant 0 : index
    %c0_1 = arith.constant 0 : index
    %c0_2 = arith.constant 0 : index
    %0 = vector.load %arg3[%c0, %c0_0, %c0_1, %c0_2] : memref<1x2x16x128xf32, #tpu.memory_space<vmem>>, vector<1x1x16x128xf32>
    %1 = vector.shape_cast %0 : vector<1x1x16x128xf32> to vector<16x128xf32>
    %c0_3 = arith.constant 0 : index
    %c1 = arith.constant 1 : index
    %c0_4 = arith.constant 0 : index
    %c0_5 = arith.constant 0 : index
    %2 = vector.load %arg3[%c0_3, %c1, %c0_4, %c0_5] : memref<1x2x16x128xf32, #tpu.memory_space<vmem>>, vector<1x1x16x128xf32>
    %3 = vector.shape_cast %2 : vector<1x1x16x128xf32> to vector<16x128xf32>
    %c0_6 = arith.constant 0 : index
    %c0_7 = arith.constant 0 : index
    %c0_8 = arith.constant 0 : index
    %c0_9 = arith.constant 0 : index
    %4 = vector.load %arg4[%c0_6, %c0_7, %c0_8, %c0_9] : memref<1x2x16x128xf32, #tpu.memory_space<vmem>>, vector<1x1x16x128xf32>
    %5 = vector.shape_cast %4 : vector<1x1x16x128xf32> to vector<16x128xf32>
    %c0_10 = arith.constant 0 : index
    %c1_11 = arith.constant 1 : index
    %c0_12 = arith.constant 0 : index
    %c0_13 = arith.constant 0 : index
    %6 = vector.load %arg4[%c0_10, %c1_11, %c0_12, %c0_13] : memref<1x2x16x128xf32, #tpu.memory_space<vmem>>, vector<1x1x16x128xf32>
    %7 = vector.shape_cast %6 : vector<1x1x16x128xf32> to vector<16x128xf32>
    %8 = arith.mulf %1, %5 : vector<16x128xf32>
    %9 = arith.mulf %3, %7 : vector<16x128xf32>
    %10 = arith.subf %8, %9 : vector<16x128xf32>
    %11 = arith.mulf %1, %7 : vector<16x128xf32>
    %12 = arith.mulf %3, %5 : vector<16x128xf32>
    %13 = arith.addf %11, %12 : vector<16x128xf32>
    %c0_14 = arith.constant 0 : index
    %c0_15 = arith.constant 0 : index
    %c0_16 = arith.constant 0 : index
    %14 = vector.load %arg6[%c0_14, %c0_15, %c0_16] : memref<2x8x16xf32, #tpu.memory_space<vmem>>, vector<1x8x16xf32>
    %15 = vector.shape_cast %14 : vector<1x8x16xf32> to vector<8x16xf32>
    %c1_17 = arith.constant 1 : index
    %c0_18 = arith.constant 0 : index
    %c0_19 = arith.constant 0 : index
    %16 = vector.load %arg6[%c1_17, %c0_18, %c0_19] : memref<2x8x16xf32, #tpu.memory_space<vmem>>, vector<1x8x16xf32>
    %17 = vector.shape_cast %16 : vector<1x8x16xf32> to vector<8x16xf32>
    %cst = arith.constant dense<0.000000e+00> : vector<8x128xf32>
    %18 = tpu.matmul %15, %10, %cst {dimension_numbers = #tpu.dot_dimension_numbers<[1], [0], [0], [1], [0, 0, 1, 1], [], []>} : vector<8x16xf32>, vector<16x128xf32>, vector<8x128xf32> -> vector<8x128xf32>
    %cst_20 = arith.constant dense<0.000000e+00> : vector<8x128xf32>
    %19 = tpu.matmul %17, %13, %cst_20 {dimension_numbers = #tpu.dot_dimension_numbers<[1], [0], [0], [1], [0, 0, 1, 1], [], []>} : vector<8x16xf32>, vector<16x128xf32>, vector<8x128xf32> -> vector<8x128xf32>
    %20 = arith.subf %18, %19 : vector<8x128xf32>
    %cst_21 = arith.constant dense<0.000000e+00> : vector<8x128xf32>
    %21 = tpu.matmul %15, %13, %cst_21 {dimension_numbers = #tpu.dot_dimension_numbers<[1], [0], [0], [1], [0, 0, 1, 1], [], []>} : vector<8x16xf32>, vector<16x128xf32>, vector<8x128xf32> -> vector<8x128xf32>
    %cst_22 = arith.constant dense<0.000000e+00> : vector<8x128xf32>
    %22 = tpu.matmul %17, %10, %cst_22 {dimension_numbers = #tpu.dot_dimension_numbers<[1], [0], [0], [1], [0, 0, 1, 1], [], []>} : vector<8x16xf32>, vector<16x128xf32>, vector<8x128xf32> -> vector<8x128xf32>
    %23 = arith.addf %21, %22 : vector<8x128xf32>
    %c0_23 = arith.constant 0 : index
    %c0_24 = arith.constant 0 : index
    %c0_25 = arith.constant 0 : index
    %c0_26 = arith.constant 0 : index
    %24 = vector.load %arg7[%c0_23, %c0_24, %c0_25, %c0_26] : memref<1x2x128x128xf32, #tpu.memory_space<vmem>>, vector<1x1x128x128xf32>
    %25 = vector.shape_cast %24 : vector<1x1x128x128xf32> to vector<128x128xf32>
    %c0_27 = arith.constant 0 : index
    %c1_28 = arith.constant 1 : index
    %c0_29 = arith.constant 0 : index
    %c0_30 = arith.constant 0 : index
    %26 = vector.load %arg7[%c0_27, %c1_28, %c0_29, %c0_30] : memref<1x2x128x128xf32, #tpu.memory_space<vmem>>, vector<1x1x128x128xf32>
    %27 = vector.shape_cast %26 : vector<1x1x128x128xf32> to vector<128x128xf32>
    %cst_31 = arith.constant dense<0.000000e+00> : vector<8x128xf32>
    %28 = tpu.matmul %20, %25, %cst_31 {dimension_numbers = #tpu.dot_dimension_numbers<[1], [0], [0], [1], [0, 0, 1, 1], [], []>} : vector<8x128xf32>, vector<128x128xf32>, vector<8x128xf32> -> vector<8x128xf32>
    %cst_32 = arith.constant dense<0.000000e+00> : vector<8x128xf32>
    %29 = tpu.matmul %23, %27, %cst_32 {dimension_numbers = #tpu.dot_dimension_numbers<[1], [0], [0], [1], [0, 0, 1, 1], [], []>} : vector<8x128xf32>, vector<128x128xf32>, vector<8x128xf32> -> vector<8x128xf32>
    %30 = arith.subf %28, %29 : vector<8x128xf32>
    %cst_33 = arith.constant dense<0.000000e+00> : vector<8x128xf32>
    %31 = tpu.matmul %20, %27, %cst_33 {dimension_numbers = #tpu.dot_dimension_numbers<[1], [0], [0], [1], [0, 0, 1, 1], [], []>} : vector<8x128xf32>, vector<128x128xf32>, vector<8x128xf32> -> vector<8x128xf32>
    %cst_34 = arith.constant dense<0.000000e+00> : vector<8x128xf32>
    %32 = tpu.matmul %23, %25, %cst_34 {dimension_numbers = #tpu.dot_dimension_numbers<[1], [0], [0], [1], [0, 0, 1, 1], [], []>} : vector<8x128xf32>, vector<128x128xf32>, vector<8x128xf32> -> vector<8x128xf32>
    %33 = arith.addf %31, %32 : vector<8x128xf32>
    %c0_35 = arith.constant 0 : index
    %c0_36 = arith.constant 0 : index
    %c0_37 = arith.constant 0 : index
    %c0_38 = arith.constant 0 : index
    %34 = vector.load %arg5[%c0_35, %c0_36, %c0_37, %c0_38] : memref<1x2x8x128xf32, #tpu.memory_space<vmem>>, vector<1x1x8x128xf32>
    %35 = vector.shape_cast %34 : vector<1x1x8x128xf32> to vector<8x128xf32>
    %c0_39 = arith.constant 0 : index
    %c1_40 = arith.constant 1 : index
    %c0_41 = arith.constant 0 : index
    %c0_42 = arith.constant 0 : index
    %36 = vector.load %arg5[%c0_39, %c1_40, %c0_41, %c0_42] : memref<1x2x8x128xf32, #tpu.memory_space<vmem>>, vector<1x1x8x128xf32>
    %37 = vector.shape_cast %36 : vector<1x1x8x128xf32> to vector<8x128xf32>
    %38 = arith.mulf %30, %35 : vector<8x128xf32>
    %39 = arith.mulf %33, %37 : vector<8x128xf32>
    %40 = arith.subf %38, %39 : vector<8x128xf32>
    %c0_43 = arith.constant 0 : index
    %c0_44 = arith.constant 0 : index
    %c0_45 = arith.constant 0 : index
    %c0_46 = arith.constant 0 : index
    %41 = vector.load %arg8[%c0_43, %c0_44, %c0_45, %c0_46] : memref<1x1x8x128xf32, #tpu.memory_space<vmem>>, vector<1x1x8x128xf32>
    %42 = vector.shape_cast %41 : vector<1x1x8x128xf32> to vector<8x128xf32>
    %43 = vector.shape_cast %40 : vector<8x128xf32> to vector<1x1x8x128xf32>
    tpu.vector_store %arg8[%c0_43, %c0_44, %c0_45, %c0_46], %43 {strides = array<i32>} : memref<1x1x8x128xf32, #tpu.memory_space<vmem>>, vector<1x1x8x128xf32>,
    %44 = arith.mulf %30, %37 : vector<8x128xf32>
    %45 = arith.mulf %33, %35 : vector<8x128xf32>
    %46 = arith.addf %44, %45 : vector<8x128xf32>
    %c0_47 = arith.constant 0 : index
    %c0_48 = arith.constant 0 : index
    %c0_49 = arith.constant 0 : index
    %c0_50 = arith.constant 0 : index
    %47 = vector.load %arg9[%c0_47, %c0_48, %c0_49, %c0_50] : memref<1x1x8x128xf32, #tpu.memory_space<vmem>>, vector<1x1x8x128xf32>
    %48 = vector.shape_cast %47 : vector<1x1x8x128xf32> to vector<8x128xf32>
    %49 = vector.shape_cast %46 : vector<8x128xf32> to vector<1x1x8x128xf32>
    tpu.vector_store %arg9[%c0_47, %c0_48, %c0_49, %c0_50], %49 {strides = array<i32>} : memref<1x1x8x128xf32, #tpu.memory_space<vmem>>, vector<1x1x8x128xf32>,
    return
  }
  func.func @transform_0(%arg0: i32, %arg1: i32, %arg2: i32) -> (i32, i32, i32, i32) {
    %c0_i32 = arith.constant 0 : i32
    %c0_i32_0 = arith.constant 0 : i32
    %c0_i32_1 = arith.constant 0 : i32
    %c0_i32_2 = arith.constant 0 : i32
    return %arg0, %c0_i32, %c0_i32_0, %c0_i32_1 : i32, i32, i32, i32
  }
  func.func @transform_1(%arg0: i32, %arg1: i32, %arg2: i32) -> (i32, i32, i32, i32) {
    %c0_i32 = arith.constant 0 : i32
    %c0_i32_0 = arith.constant 0 : i32
    %c0_i32_1 = arith.constant 0 : i32
    %c0_i32_2 = arith.constant 0 : i32
    return %arg1, %c0_i32, %c0_i32_0, %c0_i32_1 : i32, i32, i32, i32
  }
  func.func @transform_2(%arg0: i32, %arg1: i32, %arg2: i32) -> (i32, i32, i32, i32) {
    %c0_i32 = arith.constant 0 : i32
    %c0_i32_0 = arith.constant 0 : i32
    %c0_i32_1 = arith.constant 0 : i32
    return %arg1, %c0_i32, %arg2, %c0_i32_0 : i32, i32, i32, i32
  }
  func.func @transform_3(%arg0: i32, %arg1: i32, %arg2: i32) -> (i32, i32, i32) {
    %c0_i32 = arith.constant 0 : i32
    %c0_i32_0 = arith.constant 0 : i32
    %c0_i32_1 = arith.constant 0 : i32
    return %c0_i32, %arg2, %c0_i32_0 : i32, i32, i32
  }
  func.func @transform_4(%arg0: i32, %arg1: i32, %arg2: i32) -> (i32, i32, i32, i32) {
    %c0_i32 = arith.constant 0 : i32
    %c0_i32_0 = arith.constant 0 : i32
    %c0_i32_1 = arith.constant 0 : i32
    %c0_i32_2 = arith.constant 0 : i32
    return %arg1, %c0_i32, %c0_i32_0, %c0_i32_1 : i32, i32, i32, i32
  }
  func.func @transform_5(%arg0: i32, %arg1: i32, %arg2: i32) -> (i32, i32, i32, i32) {
    %c0_i32 = arith.constant 0 : i32
    %c0_i32_0 = arith.constant 0 : i32
    return %arg0, %arg1, %arg2, %c0_i32 : i32, i32, i32, i32
  }
  func.func @transform_6(%arg0: i32, %arg1: i32, %arg2: i32) -> (i32, i32, i32, i32) {
    %c0_i32 = arith.constant 0 : i32
    %c0_i32_0 = arith.constant 0 : i32
    return %arg0, %arg1, %arg2, %c0_i32 : i32, i32, i32, i32
  }
}

</mosaic_0001>

<bundles_post_ra>
// kernel: tpu_custom_call.1
= control target key start
LH: loop header
LB: loop body
LE: loop exit
PB: predicated region body
PF: predicated region fallthrough
CT: control target
= control target key end

     0   :  { %s2515_s0 = inlined_call_operand.hbm [shape: f32[1,2,16,128], index: 0, kind: input, shape index: {}]   ;;  %s2516_s1 = inlined_call_operand.hbm [shape: f32[1,2,16,128], index: 1, kind: input, shape index: {}]   ;;  %s2517_s2 = inlined_call_operand.hbm [shape: f32[1,2,16,128], index: 2, kind: input, shape index: {}]   ;;  %s2518_s3 = inlined_call_operand.hbm [shape: f32[2,16,16], index: 3, kind: input, shape index: {}]   ;;  %s2519_s4 = inlined_call_operand.hbm [shape: f32[1,2,128,128], index: 4, kind: input, shape index: {}]   ;;  %s2520_s5 = inlined_call_operand.hbm [shape: f32[1,1,16,128], index: 5, kind: output, shape index: {0}]   ;;  %s2521_s6 = inlined_call_operand.hbm [shape: f32[1,1,16,128], index: 6, kind: output, shape index: {1}]  }
   0x1   :  { %2543 = sst [smem:[#allocation26_spill]] %s2515_s0 }
   0x2   :  { %2544 = sst [smem:[#allocation27_spill]] %s2516_s1 }
   0x3   :  { %2545 = sst [smem:[#allocation28_spill]] %s2517_s2 }
   0x4   :  { %2546 = sst [smem:[#allocation29_spill]] %s2520_s5 }
   0x5   :  { %2547 = sst [smem:[#allocation30_spill]] %s2521_s6 }
   0x6   :  { %12 = vsyncpa [#allocation3], 0 }
   0x7   :  { %13 = vsyncpa [#allocation6], 0 }
   0x8   :  { %14 = vsyncpa [#allocation4], 0 }
   0x9   :  { %16 = vsyncpa [#allocation4 + $0x1], 0 }
   0xa   :  { %17 = vsyncpa [#allocation12], 0 }
   0xb   :  { %19 = vsyncpa [#allocation12 + $0x1], 0  ;;  %s2087_s21 = smov 0   ;;  %s2089_s22 = smov 0  }
   0xc   :  { %s2091_s23 = smov 0   ;;  %s2093_s24 = smov 0  }
   0xd   :  { %s2095_s25 = smov 0   ;;  %s2097_s26 = smov 0  }
   0xe LB: > { %2548 = sst [smem:[#allocation19_spill]] %s2017_s21  ;;  %s2118_s27 = sadd.s32 4294967295, %s2037_s26   ;;  %s2037_s26 = sphi %s2097_s26, %s25_s26   ;;  %s2033_s25 = sphi %s2095_s25, %s2596_s25   ;;  %s2029_s24 = sphi %s2093_s24, %s2595_s24   ;;  %s2025_s23 = sphi %s2091_s23, %s2591_s23   ;;  %s2021_s22 = sphi %s2089_s22, %s2594_s22   ;;  %s2017_s21 = sphi %s2087_s21, %s2593_s21  }
   0xf   : > { %2549 = sst [smem:[#allocation20_spill]] %s2025_s23  ;;  %s1268_s28 = sadd.s32 4294967294, %s2037_s26  }
  0x10   : > { %2550 = sst [smem:[#allocation21_spill]] %s2037_s26  ;;  %p112_p0 = scmp.ne.s32.totalorder %s2025_s23, %s2021_s22 }
  0x11   : > { %p113_p1 = scmp.eq.s32.totalorder %s2037_s26, 0  ;;  %p118_p2 = scmp.ne.s32.totalorder %s2021_s22, %s2017_s21 }
  0x12   : > { %p2522_p3 = scmp.eq.s32.totalorder %s2118_s27, 0  ;;  %p198_p4 = scmp.eq.s32.totalorder %s2118_s27, 1 }
  0x13   : > { %p2129_p5 = por %p113_p1, %p112_p0  ;;  %p204_p6 = scmp.eq.s32.totalorder %s1268_s28, 1 }
  0x14   : > { %p2135_p7 = por %p2522_p3, %p118_p2  ;;  %p2139_p8 = por %p198_p4, %p112_p0 }
  0x15   : > { %p2143_p9 = por %p204_p6, %p118_p2  ;;  %p1269_p10 = scmp.ge.s32.totalorder %s2037_s26, 1 }
  0x16   : > { %s2552_s7 = scalar_select %p2135_p7, 1, 0 }
  0x17   : > { %s2553_s8 = scalar_select %p2139_p8, 1, 0 }
  0x18   : > { %s2555_s9 = scalar_select %p2143_p9, 1, 0 }
  0x19   : > { %2554 = sst [smem:[#allocation22_spill]] %s2553_s8  ;;  %p241_p11 = scmp.lt.s32.totalorder %s2037_s26, 3 }
  0x1a   : > { %2556 = sst [smem:[#allocation23_spill]] %s2555_s9  ;;  %s2039_s11 = smov [#allocation2]  }
  0x1b   : > { %p2149_p12 = pnand %p1269_p10, %p241_p11  ;;  %s256_s12 = sshll.u32 %s2039_s11, 4  ;;  %s2153_s12 = int_to_ptr.vmem [resolvable:$true] %s256_s12 }
  0x1c   : > { %p1705_p1 = scmp.lt.s32.totalorder %s2037_s26, 2  ;;  %s2040_s14 = smov [#allocation5]  }
  0x1d   : > { %s2557_s10 = scalar_select %p2149_p12, 1, 0 }
  0x1e   : > { %p1678_p13 = pneg %p2149_p12  ;;  %s272_s15 = sshll.u32 %s2040_s14, 4  ;;  %s2171_s15 = int_to_ptr.vmem [resolvable:$true] %s272_s15 }
  0x1f   : > { %p2167_p4 = pnand %p1705_p1, %p2129_p5  ;;  %s2560_s0 = sld [smem:[#allocation26_spill]] }
  0x20   : > { %p2161_p2 = pnand %p1678_p13, %p2522_p3 }
  0x22   : > { %s2558_s13 = scalar_select %p2161_p2, 1, 0 }
  0x23   : > { %p2181_p10 = pneg %p2161_p2 }
  0x25   : > { %s1767_s19 = scalar_lea.hbm %s2560_s0, 512 }
  0x26   : > { %p1768_p6 = scmp.ne.s32.totalorder %s2560_s0, %s1767_s19  ;;  %p1774_p13 = scmp.lt.u32.totalorder %s1767_s19, %s2560_s0 }
  0x28   : > { %p1770_p5 = pnand %p2181_p10, %p1768_p6 }
  0x2a   : > { %p1771_p11 = pneg %p1770_p5 }
  0x2c   : > { %p1776_p1 = pnand %p1774_p13, %p1771_p11 }
  0x2e   : > { %1779 = shalt.err (!%p1776_p1)
}
  0x2f   : > { %s1780_s17 = scalar_lea.vmem %s2153_s12, 512  ;;  %p1788_p8 = scmp.lt.s32.totalorder %s2153_s12, %s2153_s12 }
  0x30   : > { %p1781_p0 = scmp.ne.s32.totalorder %s2153_s12, %s1780_s17  ;;  %p1789_p7 = scmp.lt.s32.totalorder %s1780_s17, %s1780_s17 }
  0x32   : > { %p1783_p3 = pnand %p1781_p0, %p2181_p10  ;;  %p1790_p6 = por %p1789_p7, %p1788_p8 }
  0x34   : > { %p1784_p9 = pneg %p1783_p3 }
  0x36   : > { %p1791_p5 = pnand %p1790_p6, %p1784_p9 }
  0x38   : > { %1794 = shalt.err (!%p1791_p5)
}
  0x39   : > { %s2528_s18 = smov 128   ;;  %s2530_s19 = smov 8  }
  0x3a   : > { %1681 = dma.hbm_to_vmem [thread:$0]  (!%p2161_p2), %s2560_s0, 512, %s2153_s12, [#allocation3], %s2528_s18, %s2528_s18, %s2530_s19  }
  0x3b   : > { %s2562_s1 = sld [smem:[#allocation27_spill]] }
  0x41   : > { %s1795_s17 = scalar_lea.hbm %s2562_s1, 512 }
  0x42   : > { %p1796_p3 = scmp.ne.s32.totalorder %s2562_s1, %s1795_s17  ;;  %p1802_p9 = scmp.lt.u32.totalorder %s1795_s17, %s2562_s1 }
  0x44   : > { %p1798_p7 = pnand %p1796_p3, %p2181_p10 }
  0x46   : > { %p1799_p8 = pneg %p1798_p7 }
  0x48   : > { %p1804_p0 = pnand %p1802_p9, %p1799_p8 }
  0x4a   : > { %1807 = shalt.err (!%p1804_p0)
}
  0x4b   : > { %s1808_s12 = scalar_lea.vmem %s2171_s15, 512  ;;  %p1816_p6 = scmp.lt.s32.totalorder %s2171_s15, %s2171_s15 }
  0x4c   : > { %p1809_p11 = scmp.ne.s32.totalorder %s2171_s15, %s1808_s12  ;;  %p1817_p5 = scmp.lt.s32.totalorder %s1808_s12, %s1808_s12 }
  0x4e   : > { %p1811_p13 = pnand %p1809_p11, %p2181_p10  ;;  %p1818_p3 = por %p1817_p5, %p1816_p6 }
  0x50   : > { %p1812_p1 = pneg %p1811_p13 }
  0x52   : > { %p1819_p7 = pnand %p1818_p3, %p1812_p1 }
  0x54   : > { %1822 = shalt.err (!%p1819_p7)
}
  0x55   : > { %1684 = dma.hbm_to_vmem [thread:$0]  (!%p2161_p2), %s2562_s1, 512, %s2171_s15, [#allocation6], %s2528_s18, %s2528_s18, %s2530_s19  }
  0x56   : > { %s37_s29 = sadd.s32 1, %s2033_s25  ;;  %s302_s9 = sand.u32 1, %s2037_s26  }
  0x57   : > { %p38_p8 = scmp.ge.s32.totalorder %s37_s29, 2  ;;  %s304_s20 = sand.u32 1, %s2025_s23  }
  0x58   : > { %s2532_s28 = sshll.u32 %s2033_s25, 7  ;;  %s2237_s30 = sshll.u32 %s304_s20, 4 }
  0x59   : > { %s2598_s29 = smov (%p38_p8, %s37_s29), 0  ;;  %s2564_s2 = sld [smem:[#allocation28_spill]] }
  0x5a   : > { %2563 = sst [smem:[#allocation24_spill]] %s2598_s29  ;;  %s101_s15 = ssub.s32 %s2033_s25, %s2598_s29 }
  0x5b   : > { %p103_p9 = scmp.eq.s32.totalorder %s101_s15, 0  ;;  %s306_s6 = scalar_lea.vmem [#allocation7], %s2237_s30 }
  0x5c   : > { %s314_s21 = sshll.u32 %s306_s6, 4  ;;  %s2565_s18 = sadd.s32 1, %s2025_s23  ;;  %s2249_s21 = int_to_ptr.vmem [resolvable:$true] %s314_s21 }
  0x5d   : > { %s2254_s20 = scalar_select %p103_p9, %s2025_s23, %s2565_s18  }
  0x5e   : > { %s2256_s19 = scalar_lea.sflag [#allocation3], %s302_s9  ;;  %p2542_p11 = pneg %p2167_p4 }
  0x5f   : > { %s2244_s12 = scalar_lea.hbm %s2564_s2, %s2532_s28  ;;  %2566 = sst [smem:[#allocation25_spill]] %s2254_s20 }
  0x60   : > { %s1823_s0 = scalar_lea.hbm %s2244_s12, 256  ;;  %s1828_s15 = scalar_lea.hbm %s2564_s2, 512 }
  0x61   : > { %p1824_p0 = scmp.ne.s32.totalorder %s2244_s12, %s1823_s0  ;;  %p1829_p6 = scmp.lt.u32.totalorder %s2244_s12, %s2564_s2 }
  0x62   : > { %p1830_p5 = scmp.lt.u32.totalorder %s1828_s15, %s1823_s0  ;;  %p1832_p7 = scmp.lt.u32.totalorder %s1823_s0, %s2244_s12 }
  0x63   : > { %p1826_p13 = pnand %p2542_p11, %p1824_p0 }
  0x64   : > { %p1831_p3 = por %p1830_p5, %p1829_p6 }
  0x65   : > { %p1827_p1 = pneg %p1826_p13 }
  0x66   : > { %p1833_p8 = por %p1832_p7, %p1831_p3 }
  0x68   : > { %p1834_p9 = pnand %p1833_p8, %p1827_p1 }
  0x6a   : > { %1837 = shalt.err (!%p1834_p9)
}
  0x6b   : > { %s1838_s18 = scalar_lea.vmem %s2249_s21, 256  ;;  %s2043_s9 = smov [#allocation7]  }
  0x6c   : > { %p1839_p0 = scmp.ne.s32.totalorder %s2249_s21, %s1838_s18  ;;  %s1843_s14 = sshll.u32 %s2043_s9, 4  ;;  %s1844_s14 = int_to_ptr.vmem [resolvable:$false] %s1843_s14 }
  0x6d   : > { %s1845_s28 = scalar_lea.vmem %s1844_s14, 512  ;;  %p1846_p2 = scmp.lt.s32.totalorder %s2249_s21, %s1844_s14 }
  0x6e   : > { %p1841_p13 = pnand %p1839_p0, %p2542_p11  ;;  %p1847_p6 = scmp.lt.s32.totalorder %s1845_s28, %s1838_s18 }
  0x70   : > { %p1842_p12 = pneg %p1841_p13  ;;  %p1848_p5 = por %p1847_p6, %p1846_p2 }
  0x72   : > { %p1849_p3 = pnand %p1848_p5, %p1842_p12 }
  0x74   : > { %1852 = shalt.err (!%p1849_p3)
}
  0x75   : > { %s2044_s0 = smov 256   ;;  %s2567_s17 = smov 8  }
  0x76   : > { %s2568_s15 = smov 128   ;;  %s2045_s6 = smov [#allocation9]  }
  0x77   : > { %1691 = dma.hbm_to_vmem [thread:$0]  (!%p2167_p4), %s2244_s12, 256, %s2249_s21, %s2256_s19, %s2044_s0, %s2568_s15, %s2567_s17  }
  0x78   : > { %s288_s9 = sshll.u32 %s2045_s6, 4  ;;  %s2569_s14 = sshll.u32 %s2033_s25, 7  ;;  %s289_s9 = int_to_ptr.vmem [resolvable:$true] %s288_s9 }
  0x79   : > { %s2292_s1 = scalar_lea.hbm %s2518_s3, %s2569_s14  ;;  %s328_s2 = scalar_lea.vmem [#allocation8], %s2237_s30 }
  0x7a   : > { %s334_s29 = sshll.u32 %s328_s2, 4  ;;  %s1853_s26 = scalar_lea.hbm %s2519_s4, 4096  ;;  %s2316_s29 = int_to_ptr.vmem [resolvable:$true] %s334_s29 }
  0x7b   : > { %p1854_p12 = scmp.ne.s32.totalorder %s2519_s4, %s1853_s26  ;;  %p1860_p7 = scmp.lt.u32.totalorder %s1853_s26, %s2519_s4 }
  0x7d   : > { %p1856_p2 = pnand %p1854_p12, %p2181_p10 }
  0x7f   : > { %p1857_p1 = pneg %p1856_p2 }
  0x81   : > { %p1862_p8 = pnand %p1860_p7, %p1857_p1 }
  0x83   : > { %1865 = shalt.err (!%p1862_p8)
}
  0x84   : > { %s1866_s6 = scalar_lea.vmem %s289_s9, 4096  ;;  %p1874_p6 = scmp.lt.s32.totalorder %s289_s9, %s289_s9 }
  0x85   : > { %p1867_p9 = scmp.ne.s32.totalorder %s289_s9, %s1866_s6  ;;  %p1875_p5 = scmp.lt.s32.totalorder %s1866_s6, %s1866_s6 }
  0x87   : > { %p1869_p0 = pnand %p1867_p9, %p2181_p10  ;;  %p1876_p3 = por %p1875_p5, %p1874_p6 }
  0x89   : > { %p1870_p13 = pneg %p1869_p0 }
  0x8b   : > { %p1877_p11 = pnand %p1876_p3, %p1870_p13 }
  0x8d   : > { %1880 = shalt.err (!%p1877_p11)
}
  0x8e   : > { %p2570_p12 = scmp.ne.s32.totalorder %s2558_s13, 0  ;;  %s1881_s23 = scalar_lea.hbm %s2292_s1, 256 }
  0x8f   : > { %p1882_p10 = scmp.ne.s32.totalorder %s2292_s1, %s1881_s23  ;;  %p2571_p11 = pneg %p2167_p4 }
  0x90   : > { %1687 = dma.hbm_to_vmem [thread:$0]  (!%p2570_p12), %s2519_s4, 4096, %s289_s9, [#allocation6], %s2568_s15, %s2568_s15, %s2567_s17  }
  0x91   : > { %p1884_p2 = pnand %p1882_p10, %p2571_p11  ;;  %s1886_s13 = scalar_lea.hbm %s2518_s3, 512 }
  0x92   : > { %p1887_p7 = scmp.lt.u32.totalorder %s2292_s1, %s2518_s3  ;;  %p1888_p8 = scmp.lt.u32.totalorder %s1886_s13, %s1881_s23 }
  0x93   : > { %p1885_p1 = pneg %p1884_p2  ;;  %p1890_p0 = scmp.lt.u32.totalorder %s1881_s23, %s2292_s1 }
  0x94   : > { %p1889_p9 = por %p1888_p8, %p1887_p7 }
  0x96   : > { %p1891_p13 = por %p1890_p0, %p1889_p9 }
  0x98   : > { %p1892_p6 = pnand %p1891_p13, %p1885_p1 }
  0x9a   : > { %1895 = shalt.err (!%p1892_p6)
}
  0x9b   : > { %s1896_s20 = scalar_lea.vmem %s2316_s29, 256  ;;  %p2572_p3 = pmov %p2571_p11 }
  0x9c   : > { %p1897_p5 = scmp.ne.s32.totalorder %s2316_s29, %s1896_s20  ;;  %s2046_s9 = smov [#allocation8]  }
  0x9d   : > { %s1901_s14 = sshll.u32 %s2046_s9, 4  ;;  %s1902_s14 = int_to_ptr.vmem [resolvable:$false] %s1901_s14 }
  0x9e   : > { %p1899_p12 = pnand %p1897_p5, %p2572_p3  ;;  %s1903_s18 = scalar_lea.vmem %s1902_s14, 512 }
  0x9f   : > { %p1904_p11 = scmp.lt.s32.totalorder %s2316_s29, %s1902_s14  ;;  %p1905_p2 = scmp.lt.s32.totalorder %s1903_s18, %s1896_s20 }
  0xa0   : > { %p1900_p10 = pneg %p1899_p12 }
  0xa1   : > { %p1906_p7 = por %p1905_p2, %p1904_p11 }
  0xa3   : > { %p1907_p8 = pnand %p1906_p7, %p1900_p10 }
  0xa5   : > { %1910 = shalt.err (!%p1907_p8)
}
  0xa6   : > { %1694 = dma.hbm_to_vmem [thread:$0]  (!%p2167_p4), %s2292_s1, 256, %s2316_s29, %s2256_s19, %s2044_s0, %s2568_s15, %s2567_s17  }
  0xa7   : > { %p2573_p1 = scmp.ne.s32.totalorder %s2557_s10, 0 }
  0xa8   : > { %p2574_p9 = scmp.eq.s32.totalorder (!%p2573_p1), %s2118_s27, 0 }
  0xa9   : > { %346 = sbr.rel (%p2573_p1) target bundleno = 707 (0x2c3), region = 40 }
  0xb0   : > { %1992 = dma.done.wait (%p2574_p9), [#allocation3], 512   ;;  %p2575_p0 = pmov %p2574_p9 }
  0xb2   : > { %1994 = vsyncadd (%p2575_p0), [#allocation3], 4294966784  ;;  %p2576_p13 = pmov %p2575_p0 }
  0xb3   : > { %p2577_p6 = pmov %p2575_p0 }
  0xb4   : > { %1996 = dma.done.wait (%p2576_p13), [#allocation6], 512  }
  0xb5   : > { %1998 = vsyncadd (%p2577_p6), [#allocation6], 4294966784  ;;  %s356_s16 = sand.u32 1, %s2118_s27   ;;  %s2357_s1 = sand.u32 1, %s2021_s22  }
  0xb6   : > { %s1281_s10 = sshll.u32 %s2357_s1, 4  ;;  %s357_s19 = scalar_lea.sflag [#allocation3], %s356_s16 }
  0xb7   : > { %s2360_s29 = scalar_lea.vmem [#allocation7], %s1281_s10  ;;  %p2578_p4 = scmp.ne.s32.totalorder %s2552_s7, 0 }
  0xb9   : > { %2000 = dma.done.wait (%p2578_p4), %s357_s19, 512  }
  0xba   : > { %2002 = vsyncadd (%p2578_p4), %s357_s19, 4294966784  ;;  %s2366_s0 = scalar_lea.vmem [#allocation8], %s1281_s10  ;;  %p2579_p5 = pmov %p2575_p0 }
  0xbb   : > { %p2580_p3 = pmov %p2575_p0 }
  0xbc   : > { %2004 = dma.done.wait (%p2579_p5), [#allocation6], 4096  }
  0xbd   : > { %2006 = vsyncadd (%p2580_p3), [#allocation6], 4294963200  ;;  %v2047_v0 = vmov 0.0|0.0   ;;  %vm2048_vm0 = vmmov 0   ;;  %v2049_v1 = vmov 0.0   ;;  %v412_v2 = vld [vmem:[#allocation2] sm:$0xff] }
  0xbe   : > { %1546 = vmatprep.subr.bf16.mxu1 %v2047_v0  ;;  %1552 = vmatprep.subr.bf16.mxu0 %v2047_v0  ;;  %v413_v3 = vld [vmem:[#allocation2 + $0x8] sm:$0xff]  ;;  %v415_v4 = vld [vmem:[#allocation2 + $0x10] sm:$0xff]  ;;  %v416_v5 = vld [vmem:[#allocation2 + $0x18] sm:$0xff]  ;;  %vm437_vm1 = vcmask 130048   ;;  %s1284_s27 = sshll.u32 %s2357_s1, 3  ;;  %s1294_s7 = sshll.u32 %s2029_s24, 7 }
  0xbf   : > { %1382 = vmatprep.mubr.msk.f32.mxu1 %vm2048_vm0, %v2049_v1  ;;  %1396 = vmatprep.mubr.msk.f32.mxu0 %vm2048_vm0, %v2049_v1  ;;  %v417_v6 = vld [vmem:[#allocation5] sm:$0xff]  ;;  %v418_v7 = vld [vmem:[#allocation5 + $0x8] sm:$0xff]  ;;  %v420_v8 = vld [vmem:[#allocation5 + $0x10] sm:$0xff]  ;;  %s404_s17 = scalar_lea.vmem [#allocation10], %s1284_s27  ;;  %s2581_s28 = sld [smem:[#allocation22_spill]] }
  0xc0   : > { %v421_v9 = vld [vmem:[#allocation5 + $0x18] sm:$0xff]  ;;  %v422_v10 = vmul.f32 %v417_v6, %v412_v2  ;;  %v423_v11 = vmul.f32 %v418_v7, %v413_v3  ;;  %v430_v12 = vmul.f32 %v417_v6, %v415_v4  ;;  %v431_v13 = vmul.f32 %v418_v7, %v416_v5  ;;  %v434_v23 = vld [vmem:[%s2366_s0] sm:$0xff]  ;;  %v726_v27 = vld [vmem:[#allocation9 + $0x8] sm:$0xff]  ;;  %s1073_s15 = sshll.u32 %s404_s17, 4  ;;  %s411_s12 = scalar_lea.vmem [#allocation11], %s1284_s27  ;;  %s2439_s15 = int_to_ptr.vmem [resolvable:$true] %s1073_s15 }
  0xc1   : > { %v424_v14 = vmul.f32 %v420_v8, %v415_v4  ;;  %v425_v15 = vmul.f32 %v421_v9, %v416_v5  ;;  %v428_v16 = vmul.f32 %v420_v8, %v412_v2  ;;  %v429_v17 = vmul.f32 %v421_v9, %v413_v3  ;;  %v1286_v24 = vld [vmem:[%s2366_s0 + $0x8] sm:$0xff]  ;;  %v725_v26 = vld [vmem:[#allocation9] sm:$0xff]  ;;  %v727_v29 = vld [vmem:[#allocation9 + $0x10] sm:$0xff]  ;;  %s1090_s21 = sshll.u32 %s411_s12, 4  ;;  %s2582_s5 = sld [smem:[#allocation29_spill]]  ;;  %s2446_s21 = int_to_ptr.vmem [resolvable:$true] %s1090_s21 }
  0xc2   : > { %v1559_v28 = vpack.c.bf16 %v726_v27, %v725_v26  ;;  %v728_v30 = vld [vmem:[#allocation9 + $0x18] sm:$0xff]  ;;  %v729_v32 = vld [vmem:[#allocation9 + $0x20] sm:$0xff]  ;;  %v730_v33 = vld [vmem:[#allocation9 + $0x28] sm:$0xff]  ;;  %s2583_s8 = sld [smem:[#allocation30_spill]]  ;;  %s1051_s11 = scalar_lea.sflag [#allocation4], %s2357_s1 }
  0xc3   : > { %v426_v18 = vsub.f32 %v422_v10, %v424_v14  ;;  %v427_v19 = vsub.f32 %v423_v11, %v425_v15  ;;  %v432_v20 = vadd.f32 %v430_v12, %v428_v16  ;;  %v433_v21 = vadd.f32 %v431_v13, %v429_v17  ;;  %v731_v35 = vld [vmem:[#allocation9 + $0x30] sm:$0xff]  ;;  %v732_v36 = vld [vmem:[#allocation9 + $0x38] sm:$0xff]  ;;  %v733_v38 = vld [vmem:[#allocation9 + $0x40] sm:$0xff]  ;;  %s1911_s30 = scalar_lea.vmem %s2439_s15, 128  ;;  %s2050_s20 = smov [#allocation10]  }
  0xc4   : > { %v1562_v31 = vpack.c.bf16 %v728_v30, %v727_v29  ;;  %v1565_v34 = vpack.c.bf16 %v730_v33, %v729_v32  ;;  %v1568_v37 = vpack.c.bf16 %v732_v36, %v731_v35  ;;  %v734_v39 = vld [vmem:[#allocation9 + $0x48] sm:$0xff]  ;;  %v735_v41 = vld [vmem:[#allocation9 + $0x50] sm:$0xff]  ;;  %v736_v42 = vld [vmem:[#allocation9 + $0x58] sm:$0xff]  ;;  %p1912_p12 = scmp.ne.s32.totalorder %s2439_s15, %s1911_s30  ;;  %s1915_s9 = sshll.u32 %s2050_s20, 4  ;;  %s1916_s9 = int_to_ptr.vmem [resolvable:$false] %s1915_s9 }
  0xc5   : > { %v1547_v22 = vpack.c.bf16 %v427_v19, %v426_v18  ;;  %v1550_v25 = vpack.c.bf16 %v433_v21, %v432_v20  ;;  %v1571_v40 = vpack.c.bf16 %v734_v39, %v733_v38  ;;  %v1574_v43 = vpack.c.bf16 %v736_v42, %v735_v41  ;;  %v737_v44 = vld [vmem:[#allocation9 + $0x60] sm:$0xff]  ;;  %v738_v45 = vld [vmem:[#allocation9 + $0x68] sm:$0xff]  ;;  %v739_v47 = vld [vmem:[#allocation9 + $0x70] sm:$0xff]  ;;  %p2584_p10 = scmp.ne.s32.totalorder %s2581_s28, 0  ;;  %s1917_s14 = scalar_lea.vmem %s1916_s9, 256 }
  0xc6   : > { %v1577_v46 = vpack.c.bf16 %v738_v45, %v737_v44  ;;  %v740_v48 = vld [vmem:[#allocation9 + $0x78] sm:$0xff]  ;;  %v742_v52 = vld [vmem:[#allocation9 + $0x80] sm:$0xff]  ;;  %v743_v53 = vld [vmem:[#allocation9 + $0x88] sm:$0xff]  ;;  %p1918_p7 = scmp.lt.s32.totalorder %s2439_s15, %s1916_s9  ;;  %p1919_p8 = scmp.lt.s32.totalorder %s1917_s14, %s1911_s30 }
  0xc7   : > { %1548 = vmatpush3.bf16.msra.mxu1 %v1547_v22  ;;  %1554 = vmatpush3.bf16.msra.mxu0 %v1547_v22  ;;  %v1580_v49 = vpack.c.bf16 %v740_v48, %v739_v47  ;;  %v1583_v55 = vpack.c.bf16 %v743_v53, %v742_v52  ;;  %v744_v58 = vld [vmem:[#allocation9 + $0x90] sm:$0xff]  ;;  %v745_v59 = vld [vmem:[#allocation9 + $0x98] sm:$0xff]  ;;  %v746_v63 = vld [vmem:[#allocation9 + $0xa0] sm:$0xff]  ;;  %s2437_s23 = scalar_lea.hbm %s2582_s5, %s1294_s7  ;;  %p1913_p11 = pnand %p1912_p12, %p2584_p10 }
  0xc8   : > { %1549 = vmatprep.subr.bf16.mxu1 %v2047_v0  ;;  %1555 = vmatprep.subr.bf16.mxu0 %v2047_v0  ;;  %v1586_v61 = vpack.c.bf16 %v745_v59, %v744_v58  ;;  %v747_v2 = vld [vmem:[#allocation9 + $0xa8] sm:$0xff]  ;;  %v748_v4 = vld [vmem:[#allocation9 + $0xb0] sm:$0xff]  ;;  %v749_v5 = vld [vmem:[#allocation9 + $0xb8] sm:$0xff]  ;;  %s2444_s13 = scalar_lea.hbm %s2583_s8, %s1294_s7  ;;  %p1920_p1 = por %p1919_p8, %p1918_p7 }
  0xc9   : > { %v1589_v3 = vpack.c.bf16 %v747_v2, %v746_v63  ;;  %v1592_v6 = vpack.c.bf16 %v749_v5, %v748_v4  ;;  %v750_v7 = vld [vmem:[#allocation9 + $0xc0] sm:$0xff]  ;;  %v751_v8 = vld [vmem:[#allocation9 + $0xc8] sm:$0xff]  ;;  %v752_v9 = vld [vmem:[#allocation9 + $0xd0] sm:$0xff]  ;;  %p1914_p2 = pneg %p1913_p11 }
  0xca   : > { %1383 = vmatmul.mubr.msk.f32.vlgmr.msra.gmra.mrb[0].mxu1 %vm437_vm1, %v434_v23  ;;  %1397 = vmatmul.mubr.msk.f32.vlgmr.msra.gmra.mrb[0].mxu0 %vm437_vm1, %v1286_v24  ;;  %v753_v10 = vld [vmem:[#allocation9 + $0xd8] sm:$0xff]  ;;  %v754_v12 = vld [vmem:[#allocation9 + $0xe0] sm:$0xff]  ;;  %v755_v13 = vld [vmem:[#allocation9 + $0xe8] sm:$0xff] }
  0xcb   : > { %1551 = vmatpush3.bf16.msra.mxu1 %v1550_v25  ;;  %1557 = vmatpush3.bf16.msra.mxu0 %v1550_v25  ;;  %v1598_v11 = vpack.c.bf16 %v753_v10, %v752_v9  ;;  %v1601_v14 = vpack.c.bf16 %v755_v13, %v754_v12  ;;  %v756_v15 = vld [vmem:[#allocation9 + $0xf0] sm:$0xff]  ;;  %v757_v16 = vld [vmem:[#allocation9 + $0xf8] sm:$0xff]  ;;  %p1921_p9 = pnand %p1920_p1, %p1914_p2 }
  0xcc   : > { %1389 = vmatprep.mubr.msk.f32.mxu1 %vm2048_vm0, %v2049_v1  ;;  %1403 = vmatprep.mubr.msk.f32.mxu0 %vm2048_vm0, %v2049_v1  ;;  %v1604_v17 = vpack.c.bf16 %v757_v16, %v756_v15  ;;  %v1039_v21 = vld [vmem:[%s2360_s29] sm:$0xff]  ;;  %v1291_v22 = vld [vmem:[%s2360_s29 + $0x8] sm:$0xff] }
  0xcd   : > { %1558 = vmatprep.subr.bf16.mxu0 %v2047_v0  ;;  %1606 = vmatprep.subr.bf16.mxu1 %v2047_v0 }
  0xce   : > { %1390 = vmatmul.mubr.msk.f32.vlgmr.msra.gmra.mrb[2].mxu1 %vm437_vm1, %v1286_v24 }
  0xcf   : > { %1608 = vmatpush3.bf16.msra.mxu1 %v1559_v28  ;;  %1508 = vmatprep.mubr.msk.f32.mxu1 %vm2048_vm0, %v2049_v1 }
  0xd0   : > { %1609 = vmatprep.subr.bf16.mxu1 %v2047_v0 }
  0xd2   : > { %1404 = vmatmul.mubr.msk.f32.vlgmr.msra.gmra.mrb[0].mxu0 %vm437_vm1, %v434_v23 }
  0xd3   : > { %1560 = vmatpush3.bf16.msra.mxu0 %v1559_v28  ;;  %1611 = vmatpush3.bf16.msra.mxu1 %v1562_v31 }
  0xd4   : > { %1561 = vmatprep.subr.bf16.mxu0 %v2047_v0  ;;  %1612 = vmatprep.subr.bf16.mxu1 %v2047_v0 }
  0xd5   : > { %1438 = vmatprep.mubr.msk.f32.mxu0 %vm2048_vm0, %v2049_v1 }
  0xd7   : > { %1563 = vmatpush3.bf16.msra.mxu0 %v1562_v31  ;;  %1614 = vmatpush3.bf16.msra.mxu1 %v1565_v34 }
  0xd8   : > { %1564 = vmatprep.subr.bf16.mxu0 %v2047_v0  ;;  %1615 = vmatprep.subr.bf16.mxu1 %v2047_v0 }
  0xdb   : > { %1566 = vmatpush3.bf16.msra.mxu0 %v1565_v34  ;;  %1617 = vmatpush3.bf16.msra.mxu1 %v1568_v37 }
  0xdc   : > { %1567 = vmatprep.subr.bf16.mxu0 %v2047_v0  ;;  %1618 = vmatprep.subr.bf16.mxu1 %v2047_v0 }
  0xdf   : > { %1569 = vmatpush3.bf16.msra.mxu0 %v1568_v37  ;;  %1620 = vmatpush3.bf16.msra.mxu1 %v1571_v40 }
  0xe0   : > { %1570 = vmatprep.subr.bf16.mxu0 %v2047_v0  ;;  %1621 = vmatprep.subr.bf16.mxu1 %v2047_v0 }
  0xe3   : > { %1572 = vmatpush3.bf16.msra.mxu0 %v1571_v40  ;;  %1623 = vmatpush3.bf16.msra.mxu1 %v1574_v43 }
  0xe4   : > { %1573 = vmatprep.subr.bf16.mxu0 %v2047_v0  ;;  %1624 = vmatprep.subr.bf16.mxu1 %v2047_v0 }
  0xe7   : > { %1575 = vmatpush3.bf16.msra.mxu0 %v1574_v43  ;;  %1626 = vmatpush3.bf16.msra.mxu1 %v1577_v46 }
  0xe8   : > { %1576 = vmatprep.subr.bf16.mxu0 %v2047_v0  ;;  %1627 = vmatprep.subr.bf16.mxu1 %v2047_v0 }
  0xeb   : > { %1578 = vmatpush3.bf16.msra.mxu0 %v1577_v46  ;;  %1629 = vmatpush3.bf16.msra.mxu1 %v1580_v49 }
  0xec   : > { %1579 = vmatprep.subr.bf16.mxu0 %v2047_v0  ;;  %1630 = vmatprep.subr.bf16.mxu1 %v2047_v0 }
  0xef   : > { %1581 = vmatpush3.bf16.msra.mxu0 %v1580_v49 }
  0xf0   : > { %1582 = vmatprep.subr.bf16.mxu0 %v2047_v0 }
 0x19d   : > { %v507_v50 = vpop.f32.mrb[0].mxu1 }
 0x19e   : > { %v1384_v51 = vpop.f32.mrb[1].mxu1 }
 0x1a1   : > { %v580_v54 = vpop.f32.mrb[2].mxu1 }
 0x1a2   : > { %v584_v56 = vsub.f32 %v507_v50, %v580_v54  ;;  %v1391_v57 = vpop.f32.mrb[3].mxu1 }
 0x1a4   : > { %1439 = vmatmul.mubr.f32.vlgmr.msra.gmra.mrb[2].mxu0 %v584_v56 }
 0x1a5   : > { %1584 = vmatpush3.bf16.msra.mxu0 %v1583_v55  ;;  %v721_v60 = vpop.f32.mrb[0].mxu0  ;;  %1473 = vmatprep.mubr.msk.f32.mxu0 %vm2048_vm0, %v2049_v1 }
 0x1a6   : > { %v1405_v62 = vpop.f32.mrb[1].mxu0  ;;  %1509 = vmatmul.mubr.f32.vlgmr.msra.gmra.mrb[4].mxu1 %v721_v60  ;;  %1585 = vmatprep.subr.bf16.mxu0 %v2047_v0 }
 0x1a7   : > { %1632 = vmatpush3.bf16.msra.mxu1 %v1583_v55  ;;  %1543 = vmatprep.mubr.msk.f32.mxu1 %vm2048_vm0, %v2049_v1  ;;  %v1595_v1 = vpack.c.bf16 %v751_v8, %v750_v7 }
 0x1a8   : > { %1633 = vmatprep.subr.bf16.mxu1 %v2047_v0 }
 0x1a9   : > { %1587 = vmatpush3.bf16.msra.mxu0 %v1586_v61 }
 0x1aa   : > { %1588 = vmatprep.subr.bf16.mxu0 %v2047_v0 }
 0x1ab   : > { %1635 = vmatpush3.bf16.msra.mxu1 %v1586_v61 }
 0x1ac   : > { %1636 = vmatprep.subr.bf16.mxu1 %v2047_v0 }
 0x1ad   : > { %1590 = vmatpush3.bf16.msra.mxu0 %v1589_v3 }
 0x1ae   : > { %1591 = vmatprep.subr.bf16.mxu0 %v2047_v0 }
 0x1af   : > { %1638 = vmatpush3.bf16.msra.mxu1 %v1589_v3 }
 0x1b0   : > { %1639 = vmatprep.subr.bf16.mxu1 %v2047_v0 }
 0x1b1   : > { %1593 = vmatpush3.bf16.msra.mxu0 %v1592_v6 }
 0x1b2   : > { %1594 = vmatprep.subr.bf16.mxu0 %v2047_v0 }
 0x1b3   : > { %1641 = vmatpush3.bf16.msra.mxu1 %v1592_v6 }
 0x1b4   : > { %1642 = vmatprep.subr.bf16.mxu1 %v2047_v0 }
 0x1b5   : > { %1596 = vmatpush3.bf16.msra.mxu0 %v1595_v1 }
 0x1b6   : > { %1597 = vmatprep.subr.bf16.mxu0 %v2047_v0 }
 0x1b7   : > { %1644 = vmatpush3.bf16.msra.mxu1 %v1595_v1 }
 0x1b8   : > { %1645 = vmatprep.subr.bf16.mxu1 %v2047_v0 }
 0x1b9   : > { %1599 = vmatpush3.bf16.msra.mxu0 %v1598_v11 }
 0x1ba   : > { %1600 = vmatprep.subr.bf16.mxu0 %v2047_v0 }
 0x1bb   : > { %1647 = vmatpush3.bf16.msra.mxu1 %v1598_v11 }
 0x1bc   : > { %1648 = vmatprep.subr.bf16.mxu1 %v2047_v0 }
 0x1bd   : > { %1602 = vmatpush3.bf16.msra.mxu0 %v1601_v14 }
 0x1be   : > { %1603 = vmatprep.subr.bf16.mxu0 %v2047_v0 }
 0x1bf   : > { %1650 = vmatpush3.bf16.msra.mxu1 %v1601_v14 }
 0x1c0   : > { %1651 = vmatprep.subr.bf16.mxu1 %v2047_v0 }
 0x1c1   : > { %1605 = vmatpush3.bf16.msra.mxu0 %v1604_v17 }
 0x1c3   : > { %1653 = vmatpush3.bf16.msra.mxu1 %v1604_v17 }
 0x1c4   : > { %1474 = vmatmul.mubr.f32.vlgmr.msra.gmra.mrb[4].mxu0 %v721_v60 }
 0x1c6   : > { %1544 = vmatmul.mubr.f32.vlgmr.msra.gmra.mrb[4].mxu1 %v584_v56 }
 0x277   : > { %v824_v18 = vpop.f32.mrb[2].mxu0 }
 0x278   : > { %v1440_v19 = vpop.f32.mrb[3].mxu0 }
 0x297   : > { %v894_v20 = vpop.f32.mrb[4].mxu0 }
 0x298   : > { %v898_v23 = vsub.f32 %v824_v18, %v894_v20  ;;  %v1475_v24 = vpop.f32.mrb[5].mxu0 }
 0x299   : > { %v1035_v25 = vpop.f32.mrb[4].mxu1 }
 0x29a   : > { %v1042_v26 = vmul.f32 %v1039_v21, %v898_v23  ;;  %v1046_v27 = vmul.f32 %v1291_v22, %v898_v23  ;;  %v1043_v0 = vmul.f32 %v1291_v22, %v1035_v25  ;;  %v1047_v28 = vmul.f32 %v1039_v21, %v1035_v25  ;;  %v1545_v29 = vpop.f32.mrb[5].mxu1 }
 0x29c   : > { %v1044_v30 = vsub.f32 %v1042_v26, %v1043_v0  ;;  %v1048_v31 = vadd.f32 %v1047_v28, %v1046_v27 }
 0x29e   : > { %1045 = vst [vmem:[%s404_s17] sm:$0xff] %v1044_v30  ;;  %1049 = vst [vmem:[%s411_s12] sm:$0xff] %v1048_v31 }
 0x29f   : > { %1924 = shalt.err (!%p1921_p9)
}
 0x2a0   : > { %s1925_s18 = scalar_lea.hbm %s2437_s23, 128  ;;  %s1929_s19 = scalar_lea.hbm %s2582_s5, 256 }
 0x2a1   : > { %p1926_p0 = scmp.ne.s32.totalorder %s2437_s23, %s1925_s18  ;;  %p1930_p4 = scmp.lt.u32.totalorder %s2437_s23, %s2582_s5 }
 0x2a2   : > { %p1931_p5 = scmp.lt.u32.totalorder %s1929_s19, %s1925_s18  ;;  %p1933_p12 = scmp.lt.u32.totalorder %s1925_s18, %s2437_s23 }
 0x2a3   : > { %p1927_p13 = pnand %p1926_p0, %p2584_p10 }
 0x2a4   : > { %p1932_p3 = por %p1931_p5, %p1930_p4 }
 0x2a5   : > { %p1928_p6 = pneg %p1927_p13 }
 0x2a6   : > { %p1934_p11 = por %p1933_p12, %p1932_p3 }
 0x2a8   : > { %p1935_p2 = pnand %p1934_p11, %p1928_p6 }
 0x2aa   : > { %1938 = shalt.err (!%p1935_p2)
}
 0x2ab   : > { %1674 = dma.vmem_to_hbm [thread:$0]  (%p2584_p10), %s2439_s15, 128, %s2437_s23, %s1051_s11  }
 0x2ac   : > { %s1056_s27 = scalar_lea.sflag [#allocation12], %s2357_s1  ;;  %s1939_s7 = scalar_lea.vmem %s2446_s21, 128 }
 0x2ad   : > { %p1940_p7 = scmp.ne.s32.totalorder %s2446_s21, %s1939_s7  ;;  %s2051_s17 = smov [#allocation11]  }
 0x2ae   : > { %s1943_s12 = sshll.u32 %s2051_s17, 4  ;;  %s1944_s12 = int_to_ptr.vmem [resolvable:$false] %s1943_s12 }
 0x2af   : > { %p1941_p8 = pnand %p1940_p7, %p2584_p10  ;;  %s1945_s6 = scalar_lea.vmem %s1944_s12, 256 }
 0x2b0   : > { %p1946_p9 = scmp.lt.s32.totalorder %s2446_s21, %s1944_s12  ;;  %p1947_p0 = scmp.lt.s32.totalorder %s1945_s6, %s1939_s7 }
 0x2b1   : > { %p1942_p1 = pneg %p1941_p8 }
 0x2b2   : > { %p1948_p13 = por %p1947_p0, %p1946_p9 }
 0x2b4   : > { %p1949_p6 = pnand %p1948_p13, %p1942_p1 }
 0x2b6   : > { %1952 = shalt.err (!%p1949_p6)
}
 0x2b7   : > { %s1953_s1 = scalar_lea.hbm %s2444_s13, 128  ;;  %s1957_s23 = scalar_lea.hbm %s2583_s8, 256 }
 0x2b8   : > { %p1954_p4 = scmp.ne.s32.totalorder %s2444_s13, %s1953_s1  ;;  %p1958_p12 = scmp.lt.u32.totalorder %s2444_s13, %s2583_s8 }
 0x2b9   : > { %p1959_p11 = scmp.lt.u32.totalorder %s1957_s23, %s1953_s1  ;;  %p1961_p7 = scmp.lt.u32.totalorder %s1953_s1, %s2444_s13 }
 0x2ba   : > { %p1955_p5 = pnand %p1954_p4, %p2584_p10 }
 0x2bb   : > { %p1960_p2 = por %p1959_p11, %p1958_p12 }
 0x2bc   : > { %p1956_p3 = pneg %p1955_p5 }
 0x2bd   : > { %p1962_p8 = por %p1961_p7, %p1960_p2 }
 0x2bf   : > { %p1963_p1 = pnand %p1962_p8, %p1956_p3 }
 0x2c1   : > { %1966 = shalt.err (!%p1963_p1)
}
 0x2c2   : > { %1675 = dma.vmem_to_hbm [thread:$0]  (%p2584_p10), %s2446_s21, 128, %s2444_s13, %s1056_s27  }
 0x2c3 PF: > { %s2585_s11 = sld [smem:[#allocation19_spill]]  ;;  %s2586_s30 = sld [smem:[#allocation23_spill]] }
 0x2c4   : > { %s2587_s20 = sld [smem:[#allocation21_spill]] }
 0x2c9   : > { %s1102_s9 = sand.u32 1, %s2585_s11   ;;  %p2588_p9 = scmp.ne.s32.totalorder %s2586_s30, 0 }
 0x2ca   : > { %p2589_p0 = scmp.ge.s32.totalorder %s2587_s20, 2  ;;  %s1103_s14 = scalar_lea.sflag [#allocation4], %s1102_s9 }
 0x2cc   : > { %p1696_p13 = pnand %p2589_p0, %p2588_p9 }
 0x2ce   : > { %2008 = dma.done.wait (!%p1696_p13), %s1103_s14, 128  }
 0x2cf   : > { %2010 = vsyncadd (!%p1696_p13), %s1103_s14, 4294967168  ;;  %s1112_s18 = scalar_lea.sflag [#allocation12], %s1102_s9 }
 0x2d0   : > { %2012 = dma.done.wait (!%p1696_p13), %s1112_s18, 128  }
 0x2d1   : > { %2014 = vsyncadd (!%p1696_p13), %s1112_s18, 4294967168  ;;  %s25_s26 = sadd.s32 1, %s2587_s20   ;;  %s2590_s28 = sld [smem:[#allocation20_spill]] }
 0x2d2   : > { %p22_p6 = scmp.ge.s32.totalorder %s25_s26, 4   ;;  %s2591_s23 = sld [smem:[#allocation25_spill]] }
 0x2d3   : > { %s2592_s13 = sld [smem:[#allocation24_spill]]  ;;  %s2593_s21 = smov %s2021_s22 }
 0x2d4   : > { %s2595_s24 = smov %s2033_s25  ;;  %24 = sbr.rel (!%p22_p6) target bundleno = 14 (0xe), region = 132 }
 0x2d7   : > { %s2594_s22 = smov %s2590_s28 }
 0x2d9   : > { %s2596_s25 = smov %s2592_s13 }
 0x2db   :  { %1117 = vsyncpa [#allocation3], 1 }
 0x2dc   :  { %1119 = vsyncpa [#allocation3 + $0x1], 1 }
 0x2dd   :  { %1120 = vsyncpa [#allocation6], 1 }
 0x2de   :  { %1121 = vsyncpa [#allocation4], 1 }
 0x2df   :  { %1123 = vsyncpa [#allocation4 + $0x1], 1 }
 0x2e0   :  { %1124 = vsyncpa [#allocation12], 1 }
 0x2e1   :  { %1126 = vsyncpa [#allocation12 + $0x1], 1 }

</bundles_post_ra>
